<compile_context>
chip_gen: v5e
topology: v5e:2x2
jax: 0.10.0
libtpu: 0.0.40
codegen_flags: <defaults>
</compile_context>

<pallas_src>
import jax
import jax.numpy as jnp
from jax.experimental import pallas as pl
from jax.experimental.pallas import tpu as pltpu


def _round_up(x, m):
    return (x + m - 1) // m * m


def _cdiv(a, b):
    return (a + b - 1) // b


def _pad_last(a, n):
    """Zero-pad the last axis of `a` up to length n."""
    pad = n - a.shape[-1]
    if pad <= 0:
        return a
    return jnp.pad(a, [(0, 0)] * (a.ndim - 1) + [(0, pad)])


def _make_neumf_kernel(n_hidden, n_emb_p, half_p, compute_dtype):
    """Kernel for one batch block (batch-on-lanes layout).

    Operand order:
      acts,                                       (packed (feat_total, Bb) tile)
      w1_u_t, w1_i_t, b1, [w_t, b] * (n_hidden-1),(resident MLP weights, (out,in))
      w_head_mf, w_head_x, b_head,                (resident head weights)
      out                                         ((1, Bb) lane-dense output row)
    """
    o_mf_u = 0
    o_mlp_u = n_emb_p
    o_mf_i = n_emb_p + half_p
    o_mlp_i = 2 * n_emb_p + half_p

    def kernel(acts_ref, *rest):
        out_ref = rest[-1]
        refs = rest[:-1]

        # --- unpack the packed activation slab with static 8-aligned slices.
        mf_u = acts_ref[o_mf_u:o_mf_u + n_emb_p, :]
        mlp_u = acts_ref[o_mlp_u:o_mlp_u + half_p, :]
        mf_i = acts_ref[o_mf_i:o_mf_i + n_emb_p, :]
        mlp_i = acts_ref[o_mlp_i:o_mlp_i + half_p, :]

        # --- GMF branch: elementwise product on the VPU, kept in f32 (v5e has
        # no bf16 VPU path).  Padded rows are zero and stay zero.
        mf_vec = mf_u.astype(jnp.float32) * mf_i.astype(jnp.float32)  # (n_emb_p, Bb)

        # --- MLP branch, batch-on-lanes: x is (out_feat, Bb) throughout.
        # First Linear as a split matmul (no concat anywhere):
        #   W1^T @ concat(u, i) == W1_u^T @ u + W1_i^T @ i.
        x = (jnp.dot(refs[0][...], mlp_u, preferred_element_type=jnp.float32)
             + jnp.dot(refs[1][...], mlp_i, preferred_element_type=jnp.float32)
             + refs[2][...])
        x = jnp.maximum(x, 0.0)

        for l in range(n_hidden - 1):
            w = refs[3 + 2 * l]
            b = refs[4 + 2 * l]
            x = jnp.dot(w[...], x.astype(compute_dtype),
                        preferred_element_type=jnp.float32) + b[...]
            x = jnp.maximum(x, 0.0)               # (layers[-1], Bb) f32

        # --- Fusion head:  w_out^T @ concat(mf_vec, x) == w_mf@mf_vec + w_x@x,
        # computed as (1,K)@(K,Bb) matmuls so the logits land directly as a
        # lane-dense (1, Bb) row (one full-width store, no masked vst).
        w_mf = refs[-3][...]                      # (1, n_emb_p)     f32
        w_x = refs[-2][...]                       # (1, layers[-1])  f32
        b_out = refs[-1][...]                     # (1, 1)           f32
        logits = (jnp.dot(w_mf, mf_vec, preferred_element_type=jnp.float32)
                  + jnp.dot(w_x, x, preferred_element_type=jnp.float32)
                  + b_out)                        # (1, Bb)
        out_ref[...] = jax.nn.sigmoid(logits)

    return kernel


def neumf_forward(users, items, params, *, compute_dtype=jnp.bfloat16,
                  block_b=2048):
    """NeuMF forward pass. Embedding gather/pack in XLA, everything else Pallas."""
    (mf_emb_user, mf_emb_item, mlp_emb_user, mlp_emb_item,
     mlp_weights, out_w, out_b) = params

    B = users.shape[0]
    n_emb = mf_emb_user.shape[1]
    half = mlp_emb_user.shape[1]
    n_hidden = len(mlp_weights)
    n_emb_p = _round_up(n_emb, 8)
    half_p = _round_up(half, 8)

    # --- batch tiling: lane-aligned block, batch padded to a multiple of it.
    # Clamp so the grid has >=2 blocks whenever the batch permits: the batch
    # axis is the only "parallel" axis and v7x has 2 TensorCores per chip
    # (no-op on single-TC v5e/v6e).
    block_b = max(128, _round_up(block_b, 128))
    block_b = min(block_b, max(128, _round_up(_cdiv(B, 2), 128)))
    B_pad = _round_up(B, block_b)
    if B_pad != B:
        pad = B_pad - B
        users = jnp.concatenate([users, jnp.zeros((pad,), users.dtype)])
        items = jnp.concatenate([items, jnp.zeros((pad,), items.dtype)])
    num_blocks = B_pad // block_b

    # --- embedding gathers (XLA glue), fused with the compute-dtype cast, the
    # transpose and the packing so activations hit HBM once, already laid out
    # as one batch-on-lanes (feat_total, B_pad) slab:
    #   rows [0, n_emb_p)                         -> mf_user   (zero-padded)
    #   rows [n_emb_p, n_emb_p + half_p)          -> mlp_user  (zero-padded)
    #   rows [.., .. + n_emb_p)                   -> mf_item
    #   rows [.., .. + half_p)                    -> mlp_item
    user_table = jnp.concatenate(
        [_pad_last(mf_emb_user, n_emb_p), _pad_last(mlp_emb_user, half_p)],
        axis=1).astype(compute_dtype)
    item_table = jnp.concatenate(
        [_pad_last(mf_emb_item, n_emb_p), _pad_last(mlp_emb_item, half_p)],
        axis=1).astype(compute_dtype)
    acts = jnp.concatenate([user_table[users].T, item_table[items].T], axis=0)
    feat_total = acts.shape[0]                    # 2 * (n_emb_p + half_p)

    # --- weights, pre-transposed to (out, in) for batch-on-lanes matmuls;
    # split W1 (removes the MLP concat) and split head weight (removes the
    # fusion concat); biases / head math stay f32.  Zero-padded "in" columns
    # line up with the zero-padded activation rows, so contributions are 0.
    w1, b1 = mlp_weights[0]
    weight_ops = [
        _pad_last(w1[:half, :].T, half_p).astype(compute_dtype),   # (l1, half_p)
        _pad_last(w1[half:, :].T, half_p).astype(compute_dtype),   # (l1, half_p)
        b1.reshape(-1, 1).astype(jnp.float32),                     # (l1, 1)
    ]
    for (w, b) in mlp_weights[1:]:
        weight_ops += [w.T.astype(compute_dtype),
                       b.reshape(-1, 1).astype(jnp.float32)]
    weight_ops += [
        _pad_last(out_w[:n_emb, 0].reshape(1, n_emb), n_emb_p).astype(jnp.float32),
        out_w[n_emb:, 0].reshape(1, -1).astype(jnp.float32),
        out_b.reshape(1, 1).astype(jnp.float32),
    ]

    # Streamed activation slab (double-buffered by Pallas); resident weights.
    act_spec = pl.BlockSpec((feat_total, block_b), lambda i: (0, i))
    w_specs = [pl.BlockSpec(w.shape, lambda i: (0, 0)) for w in weight_ops]

    out = pl.pallas_call(
        _make_neumf_kernel(n_hidden, n_emb_p, half_p, compute_dtype),
        out_shape=jax.ShapeDtypeStruct((num_blocks, block_b), jnp.float32),
        grid=(num_blocks,),
        in_specs=[act_spec] + w_specs,
        out_specs=pl.BlockSpec((1, block_b), lambda i: (i, 0)),
        compiler_params=pltpu.CompilerParams(
            dimension_semantics=("parallel",)),
    )(acts, *weight_ops)

    return out.reshape(-1)[:B].reshape(B, 1)


def neumf_reference(users, items, params):
    """Pure-JAX (f32) reference for correctness checking."""
    (mf_emb_user, mf_emb_item, mlp_emb_user, mlp_emb_item,
     mlp_weights, out_w, out_b) = params
    mf_vec = mf_emb_user[users] * mf_emb_item[items]
    x = jnp.concatenate([mlp_emb_user[users], mlp_emb_item[items]], axis=1)
    for (w, b) in mlp_weights:
        x = jnp.maximum(x @ w + b, 0.0)
    emb = jnp.concatenate([mf_vec, x], axis=1)
    return jax.nn.sigmoid(emb @ out_w + out_b)


def init_params(key, n_user, n_item, n_emb, layers):
    """Deterministic parameter init mirroring the PyTorch __init__ shapes."""
    ks = jax.random.split(key, 6 + 2 * len(layers))
    k = iter(ks)
    mf_emb_user = jax.random.normal(next(k), (n_user, n_emb), jnp.float32)
    mf_emb_item = jax.random.normal(next(k), (n_item, n_emb), jnp.float32)
    mlp_emb_user = jax.random.normal(next(k), (n_user, layers[0] // 2), jnp.float32)
    mlp_emb_item = jax.random.normal(next(k), (n_item, layers[0] // 2), jnp.float32)

    mlp_weights = []
    for i in range(1, len(layers)):
        fan_in = layers[i - 1]
        bound = 1.0 / jnp.sqrt(fan_in)
        w = jax.random.uniform(next(k), (layers[i - 1], layers[i]),
                               jnp.float32, -bound, bound)
        b = jax.random.uniform(next(k), (layers[i],), jnp.float32, -bound, bound)
        mlp_weights.append((w, b))

    head_in = n_emb + layers[-1]
    bound = 1.0 / jnp.sqrt(head_in)
    out_w = jax.random.uniform(next(k), (head_in, 1), jnp.float32, -bound, bound)
    out_b = jax.random.uniform(next(k), (1,), jnp.float32, -bound, bound)

    return (mf_emb_user, mf_emb_item, mlp_emb_user, mlp_emb_item,
            mlp_weights, out_w, out_b)


if __name__ == "__main__":
    # Small, NeuMF-shaped config.
    n_user, n_item = 32, 48
    n_emb = 8
    layers = [16, 32, 16, 8]          # MLP tower sizes; layers[0] is concat dim
    batch = 8

    key = jax.random.PRNGKey(0)
    k_params, k_u, k_i, k_u2, k_i2 = jax.random.split(key, 5)
    params = init_params(k_params, n_user, n_item, n_emb, layers)

    users = jax.random.randint(k_u, (batch,), 0, n_user, dtype=jnp.int32)
    items = jax.random.randint(k_i, (batch,), 0, n_item, dtype=jnp.int32)

    # f32 path (tight correctness check), single batch block.
    preds = jax.block_until_ready(
        neumf_forward(users, items, params, compute_dtype=jnp.float32))
    ref = neumf_reference(users, items, params)
    assert preds.shape == (batch, 1)
    assert jnp.allclose(preds, ref, atol=1e-5, rtol=1e-5), (
        f"mismatch: {preds} vs {ref}")

    # f32 path, multi-block grid (exercises batch padding + the >=2-block
    # clamp for the v7x TC split, default block sizing).
    big_b = 300
    users2 = jax.random.randint(k_u2, (big_b,), 0, n_user, dtype=jnp.int32)
    items2 = jax.random.randint(k_i2, (big_b,), 0, n_item, dtype=jnp.int32)
    preds2 = jax.block_until_ready(
        neumf_forward(users2, items2, params, compute_dtype=jnp.float32))
    ref2 = neumf_reference(users2, items2, params)
    assert preds2.shape == (big_b, 1)
    assert jnp.allclose(preds2, ref2, atol=1e-5, rtol=1e-5)

    # Default bf16 streaming path (f32 accumulation): halves the dominant
    # activation HBM traffic.
    preds_bf16 = jax.block_until_ready(neumf_forward(users2, items2, params))
    assert preds_bf16.shape == (big_b, 1)
    assert jnp.allclose(preds_bf16, ref2, atol=5e-2, rtol=5e-2)

    print("KERNEL_OK")
</pallas_src>

<mosaic_0001>
module attributes {stable_mosaic.version = 11 : i64} {
  func.func @kernel(%arg0: i32, %arg1: memref<32x128xf32, #tpu.memory_space<vmem>>, %arg2: memref<32x8xf32, #tpu.memory_space<vmem>>, %arg3: memref<32x8xf32, #tpu.memory_space<vmem>>, %arg4: memref<32x1xf32, #tpu.memory_space<vmem>>, %arg5: memref<16x32xf32, #tpu.memory_space<vmem>>, %arg6: memref<16x1xf32, #tpu.memory_space<vmem>>, %arg7: memref<8x16xf32, #tpu.memory_space<vmem>>, %arg8: memref<8x1xf32, #tpu.memory_space<vmem>>, %arg9: memref<1x8xf32, #tpu.memory_space<vmem>>, %arg10: memref<1x8xf32, #tpu.memory_space<vmem>>, %arg11: memref<1x1xf32, #tpu.memory_space<vmem>>, %arg12: memref<1x128xf32, #tpu.memory_space<vmem>>) attributes {dimension_semantics = [#tpu.dimension_semantics<parallel>], iteration_bounds = array<i64: 1>, scalar_prefetch = 0 : i64, scratch_operands = 0 : i64, tpu.core_type = #tpu.core_type<tc>, window_params = [{transform_indices = @transform_0, window_bounds = array<i64: 32, 128>}, {pipeline_mode = #tpu.pipeline_mode<synchronous>, transform_indices = @transform_1, window_bounds = array<i64: 32, 8>}, {pipeline_mode = #tpu.pipeline_mode<synchronous>, transform_indices = @transform_2, window_bounds = array<i64: 32, 8>}, {pipeline_mode = #tpu.pipeline_mode<synchronous>, transform_indices = @transform_3, window_bounds = array<i64: 32, 1>}, {pipeline_mode = #tpu.pipeline_mode<synchronous>, transform_indices = @transform_4, window_bounds = array<i64: 16, 32>}, {pipeline_mode = #tpu.pipeline_mode<synchronous>, transform_indices = @transform_5, window_bounds = array<i64: 16, 1>}, {pipeline_mode = #tpu.pipeline_mode<synchronous>, transform_indices = @transform_6, window_bounds = array<i64: 8, 16>}, {pipeline_mode = #tpu.pipeline_mode<synchronous>, transform_indices = @transform_7, window_bounds = array<i64: 8, 1>}, {pipeline_mode = #tpu.pipeline_mode<synchronous>, transform_indices = @transform_8, window_bounds = array<i64: 1, 8>}, {pipeline_mode = #tpu.pipeline_mode<synchronous>, transform_indices = @transform_9, window_bounds = array<i64: 1, 8>}, {pipeline_mode = #tpu.pipeline_mode<synchronous>, transform_indices = @transform_10, window_bounds = array<i64: 1, 1>}, {transform_indices = @transform_11, window_bounds = array<i64: 1, 128>}]} {
    %c0 = arith.constant 0 : index
    %c0_0 = arith.constant 0 : index
    %0 = vector.load %arg1[%c0, %c0_0] : memref<32x128xf32, #tpu.memory_space<vmem>>, vector<8x128xf32>
    %c8 = arith.constant 8 : index
    %c0_1 = arith.constant 0 : index
    %1 = vector.load %arg1[%c8, %c0_1] : memref<32x128xf32, #tpu.memory_space<vmem>>, vector<8x128xf32>
    %c16 = arith.constant 16 : index
    %c0_2 = arith.constant 0 : index
    %2 = vector.load %arg1[%c16, %c0_2] : memref<32x128xf32, #tpu.memory_space<vmem>>, vector<8x128xf32>
    %c24 = arith.constant 24 : index
    %c0_3 = arith.constant 0 : index
    %3 = vector.load %arg1[%c24, %c0_3] : memref<32x128xf32, #tpu.memory_space<vmem>>, vector<8x128xf32>
    %4 = arith.mulf %0, %2 : vector<8x128xf32>
    %c0_4 = arith.constant 0 : index
    %c0_5 = arith.constant 0 : index
    %5 = vector.load %arg2[%c0_4, %c0_5] : memref<32x8xf32, #tpu.memory_space<vmem>>, vector<32x8xf32>
    %cst = arith.constant dense<0.000000e+00> : vector<32x128xf32>
    %6 = tpu.matmul %5, %1, %cst {dimension_numbers = #tpu.dot_dimension_numbers<[1], [0], [0], [1], [0, 0, 1, 1], [], []>} : vector<32x8xf32>, vector<8x128xf32>, vector<32x128xf32> -> vector<32x128xf32>
    %c0_6 = arith.constant 0 : index
    %c0_7 = arith.constant 0 : index
    %7 = vector.load %arg3[%c0_6, %c0_7] : memref<32x8xf32, #tpu.memory_space<vmem>>, vector<32x8xf32>
    %cst_8 = arith.constant dense<0.000000e+00> : vector<32x128xf32>
    %8 = tpu.matmul %7, %3, %cst_8 {dimension_numbers = #tpu.dot_dimension_numbers<[1], [0], [0], [1], [0, 0, 1, 1], [], []>} : vector<32x8xf32>, vector<8x128xf32>, vector<32x128xf32> -> vector<32x128xf32>
    %9 = arith.addf %6, %8 : vector<32x128xf32>
    %c0_9 = arith.constant 0 : index
    %c0_10 = arith.constant 0 : index
    %10 = vector.load %arg4[%c0_9, %c0_10] : memref<32x1xf32, #tpu.memory_space<vmem>>, vector<32x1xf32>
    %11 = vector.broadcast %10 : vector<32x1xf32> to vector<32x128xf32>
    %12 = arith.addf %9, %11 : vector<32x128xf32>
    %cst_11 = arith.constant 0.000000e+00 : f32
    %13 = vector.broadcast %cst_11 : f32 to vector<32x128xf32>
    %14 = arith.maximumf %12, %13 : vector<32x128xf32>
    %c0_12 = arith.constant 0 : index
    %c0_13 = arith.constant 0 : index
    %15 = vector.load %arg5[%c0_12, %c0_13] : memref<16x32xf32, #tpu.memory_space<vmem>>, vector<16x32xf32>
    %cst_14 = arith.constant dense<0.000000e+00> : vector<16x128xf32>
    %16 = tpu.matmul %15, %14, %cst_14 {dimension_numbers = #tpu.dot_dimension_numbers<[1], [0], [0], [1], [0, 0, 1, 1], [], []>} : vector<16x32xf32>, vector<32x128xf32>, vector<16x128xf32> -> vector<16x128xf32>
    %c0_15 = arith.constant 0 : index
    %c0_16 = arith.constant 0 : index
    %17 = vector.load %arg6[%c0_15, %c0_16] : memref<16x1xf32, #tpu.memory_space<vmem>>, vector<16x1xf32>
    %18 = vector.broadcast %17 : vector<16x1xf32> to vector<16x128xf32>
    %19 = arith.addf %16, %18 : vector<16x128xf32>
    %cst_17 = arith.constant 0.000000e+00 : f32
    %20 = vector.broadcast %cst_17 : f32 to vector<16x128xf32>
    %21 = arith.maximumf %19, %20 : vector<16x128xf32>
    %c0_18 = arith.constant 0 : index
    %c0_19 = arith.constant 0 : index
    %22 = vector.load %arg7[%c0_18, %c0_19] : memref<8x16xf32, #tpu.memory_space<vmem>>, vector<8x16xf32>
    %cst_20 = arith.constant dense<0.000000e+00> : vector<8x128xf32>
    %23 = tpu.matmul %22, %21, %cst_20 {dimension_numbers = #tpu.dot_dimension_numbers<[1], [0], [0], [1], [0, 0, 1, 1], [], []>} : vector<8x16xf32>, vector<16x128xf32>, vector<8x128xf32> -> vector<8x128xf32>
    %c0_21 = arith.constant 0 : index
    %c0_22 = arith.constant 0 : index
    %24 = vector.load %arg8[%c0_21, %c0_22] : memref<8x1xf32, #tpu.memory_space<vmem>>, vector<8x1xf32>
    %25 = vector.broadcast %24 : vector<8x1xf32> to vector<8x128xf32>
    %26 = arith.addf %23, %25 : vector<8x128xf32>
    %cst_23 = arith.constant 0.000000e+00 : f32
    %27 = vector.broadcast %cst_23 : f32 to vector<8x128xf32>
    %28 = arith.maximumf %26, %27 : vector<8x128xf32>
    %c0_24 = arith.constant 0 : index
    %c0_25 = arith.constant 0 : index
    %29 = vector.load %arg9[%c0_24, %c0_25] : memref<1x8xf32, #tpu.memory_space<vmem>>, vector<1x8xf32>
    %c0_26 = arith.constant 0 : index
    %c0_27 = arith.constant 0 : index
    %30 = vector.load %arg10[%c0_26, %c0_27] : memref<1x8xf32, #tpu.memory_space<vmem>>, vector<1x8xf32>
    %c0_28 = arith.constant 0 : index
    %c0_29 = arith.constant 0 : index
    %31 = vector.load %arg11[%c0_28, %c0_29] : memref<1x1xf32, #tpu.memory_space<vmem>>, vector<1x1xf32>
    %cst_30 = arith.constant dense<0.000000e+00> : vector<1x128xf32>
    %32 = tpu.matmul %29, %4, %cst_30 {dimension_numbers = #tpu.dot_dimension_numbers<[1], [0], [0], [1], [0, 0, 1, 1], [], []>} : vector<1x8xf32>, vector<8x128xf32>, vector<1x128xf32> -> vector<1x128xf32>
    %cst_31 = arith.constant dense<0.000000e+00> : vector<1x128xf32>
    %33 = tpu.matmul %30, %28, %cst_31 {dimension_numbers = #tpu.dot_dimension_numbers<[1], [0], [0], [1], [0, 0, 1, 1], [], []>} : vector<1x8xf32>, vector<8x128xf32>, vector<1x128xf32> -> vector<1x128xf32>
    %34 = arith.addf %32, %33 : vector<1x128xf32>
    %35 = vector.broadcast %31 : vector<1x1xf32> to vector<1x128xf32>
    %36 = arith.addf %34, %35 : vector<1x128xf32>
    %37 = arith.negf %36 : vector<1x128xf32>
    %38 = math.exp %37 : vector<1x128xf32>
    %cst_32 = arith.constant 1.000000e+00 : f32
    %39 = vector.broadcast %cst_32 : f32 to vector<1x128xf32>
    %40 = arith.addf %39, %38 : vector<1x128xf32>
    %41 = arith.divf %39, %40 : vector<1x128xf32>
    %c0_33 = arith.constant 0 : index
    %c0_34 = arith.constant 0 : index
    %42 = vector.load %arg12[%c0_33, %c0_34] : memref<1x128xf32, #tpu.memory_space<vmem>>, vector<1x128xf32>
    tpu.vector_store %arg12[%c0_33, %c0_34], %41 {strides = array<i32>} : memref<1x128xf32, #tpu.memory_space<vmem>>, vector<1x128xf32>,
    return
  }
  func.func @transform_0(%arg0: i32) -> (i32, i32) {
    %c0_i32 = arith.constant 0 : i32
    %c0_i32_0 = arith.constant 0 : i32
    return %c0_i32, %arg0 : i32, i32
  }
  func.func @transform_1(%arg0: i32) -> (i32, i32) {
    %c0_i32 = arith.constant 0 : i32
    %c0_i32_0 = arith.constant 0 : i32
    %c0_i32_1 = arith.constant 0 : i32
    return %c0_i32, %c0_i32_0 : i32, i32
  }
  func.func @transform_2(%arg0: i32) -> (i32, i32) {
    %c0_i32 = arith.constant 0 : i32
    %c0_i32_0 = arith.constant 0 : i32
    %c0_i32_1 = arith.constant 0 : i32
    return %c0_i32, %c0_i32_0 : i32, i32
  }
  func.func @transform_3(%arg0: i32) -> (i32, i32) {
    %c0_i32 = arith.constant 0 : i32
    %c0_i32_0 = arith.constant 0 : i32
    %c0_i32_1 = arith.constant 0 : i32
    return %c0_i32, %c0_i32_0 : i32, i32
  }
  func.func @transform_4(%arg0: i32) -> (i32, i32) {
    %c0_i32 = arith.constant 0 : i32
    %c0_i32_0 = arith.constant 0 : i32
    %c0_i32_1 = arith.constant 0 : i32
    return %c0_i32, %c0_i32_0 : i32, i32
  }
  func.func @transform_5(%arg0: i32) -> (i32, i32) {
    %c0_i32 = arith.constant 0 : i32
    %c0_i32_0 = arith.constant 0 : i32
    %c0_i32_1 = arith.constant 0 : i32
    return %c0_i32, %c0_i32_0 : i32, i32
  }
  func.func @transform_6(%arg0: i32) -> (i32, i32) {
    %c0_i32 = arith.constant 0 : i32
    %c0_i32_0 = arith.constant 0 : i32
    %c0_i32_1 = arith.constant 0 : i32
    return %c0_i32, %c0_i32_0 : i32, i32
  }
  func.func @transform_7(%arg0: i32) -> (i32, i32) {
    %c0_i32 = arith.constant 0 : i32
    %c0_i32_0 = arith.constant 0 : i32
    %c0_i32_1 = arith.constant 0 : i32
    return %c0_i32, %c0_i32_0 : i32, i32
  }
  func.func @transform_8(%arg0: i32) -> (i32, i32) {
    %c0_i32 = arith.constant 0 : i32
    %c0_i32_0 = arith.constant 0 : i32
    %c0_i32_1 = arith.constant 0 : i32
    return %c0_i32, %c0_i32_0 : i32, i32
  }
  func.func @transform_9(%arg0: i32) -> (i32, i32) {
    %c0_i32 = arith.constant 0 : i32
    %c0_i32_0 = arith.constant 0 : i32
    %c0_i32_1 = arith.constant 0 : i32
    return %c0_i32, %c0_i32_0 : i32, i32
  }
  func.func @transform_10(%arg0: i32) -> (i32, i32) {
    %c0_i32 = arith.constant 0 : i32
    %c0_i32_0 = arith.constant 0 : i32
    %c0_i32_1 = arith.constant 0 : i32
    return %c0_i32, %c0_i32_0 : i32, i32
  }
  func.func @transform_11(%arg0: i32) -> (i32, i32) {
    %c0_i32 = arith.constant 0 : i32
    %c0_i32_0 = arith.constant 0 : i32
    return %arg0, %c0_i32 : i32, i32
  }
}

</mosaic_0001>

<bundles_post_ra>
// kernel: tpu_custom_call.1
= control target key start
LH: loop header
LB: loop body
LE: loop exit
PB: predicated region body
PF: predicated region fallthrough
CT: control target
= control target key end

     0   :  { %s538_s0 = inlined_call_operand.vmem [shape: f32[32,128], index: 0, kind: input, shape index: {}]   ;;  %s539_s1 = inlined_call_operand.vmem [shape: f32[32,8], index: 1, kind: input, shape index: {}]   ;;  %s540_s2 = inlined_call_operand.vmem [shape: f32[32,8], index: 2, kind: input, shape index: {}]   ;;  %s541_s3 = inlined_call_operand.vmem [shape: f32[32,1], index: 3, kind: input, shape index: {}]   ;;  %s542_s4 = inlined_call_operand.vmem [shape: f32[16,32], index: 4, kind: input, shape index: {}]   ;;  %s543_s5 = inlined_call_operand.vmem [shape: f32[16,1], index: 5, kind: input, shape index: {}]   ;;  %s544_s6 = inlined_call_operand.vmem [shape: f32[8,16], index: 6, kind: input, shape index: {}]   ;;  %s545_s7 = inlined_call_operand.vmem [shape: f32[8,1], index: 7, kind: input, shape index: {}]   ;;  %s546_s8 = inlined_call_operand.vmem [shape: f32[1,8], index: 8, kind: input, shape index: {}]   ;;  %s547_s9 = inlined_call_operand.vmem [shape: f32[1,8], index: 9, kind: input, shape index: {}]   ;;  %s548_s10 = inlined_call_operand.<no memory space> [shape: f32[1,1], index: 10, kind: input, shape index: {}]   ;;  %s549_s11 = inlined_call_operand.hbm [shape: f32[1,128], index: 11, kind: output, shape index: {}]  }
   0x1   :  { %v16_v0 = vstv %s548_s10 }
   0x2   :  { %17 = vst [vmem:[#allocation2] sm:$0x1] %v16_v0 }
   0x3   :  { %v44_v1 = vld [vmem:[%s538_s0 + $0x18] sm:$0xff]  ;;  %v42_v2 = vld [vmem:[%s538_s0 + $0x8] sm:$0xff]  ;;  %v50_v3 = vld [vmem:[%s540_s2] sm:$0xff]  ;;  %vm54_vm0 = vcmask 64512   ;;  %v388_v7 = vmov 0  }
   0x4   :  { %82 = vmatpush.msra.mxu0 %v44_v1  ;;  %123 = vmatpush.msra.mxu1 %v42_v2  ;;  %v46_v4 = vld [vmem:[%s539_s1] sm:$0xff]  ;;  %v138_v5 = vld [vmem:[%s541_s3 + $0x8] sm:$0xff]  ;;  %v140_v6 = vld [vmem:[%s541_s3 + $0x18] sm:$0xff] }
   0x5   :  { %339 = vmatmul.msk.f32.vlgmr.msra.gmra.mxu0 %vm54_vm0, %v50_v3  ;;  %343 = vmatmul.msk.f32.vlgmr.msra.gmra.mxu1 %vm54_vm0, %v46_v4 }
   0x6   :  { %356 = vset.pattern.permute.xlu1 %v388_v7  ;;  %355 = vset.pattern.permute.xlu0 %v388_v7 }
   0x7   :  { %148 = vperm.xlu1 %356, %v138_v5   ;;  %158 = vperm.xlu0 %355, %v140_v6  }
   0x8   :  { %357 = vset.pattern.permute.xlu2 %v388_v7 }
   0x9   :  { %18 = vsyncpa [#allocation4], 0  ;;  %v51_v8 = vld [vmem:[%s540_s2 + $0x8] sm:$0xff]  ;;  %v137_v10 = vld [vmem:[%s541_s3] sm:$0xff]  ;;  %vm183_vm1 = vcmask 261120   ;;  %vm222_vm2 = vcmask 130048  }
   0xa   :  { %v47_v9 = vld [vmem:[%s539_s1 + $0x8] sm:$0xff]  ;;  %v139_v11 = vld [vmem:[%s541_s3 + $0x10] sm:$0xff]  ;;  %v216_v14 = vld [vmem:[%s545_s7] sm:$0xff]  ;;  %s330_s21 = sshll.u32 %s549_s11, 4  ;;  %s331_s21 = int_to_ptr.hbm [resolvable:$true] %s330_s21 }
   0xb   :  { %v52_v12 = vld [vmem:[%s540_s2 + $0x10] sm:$0xff]  ;;  %v249_v15 = vld [vmem:[#allocation2] sm:$0x1]  ;;  %v53_v16 = vld [vmem:[%s540_s2 + $0x18] sm:$0xff] }
   0xc   :  { %v48_v13 = vld [vmem:[%s539_s1 + $0x10] sm:$0xff]  ;;  %v49_v17 = vld [vmem:[%s539_s1 + $0x18] sm:$0xff]  ;;  %v172_v22 = vld [vmem:[%s543_s5 + $0x8] sm:$0xff] }
   0xd   :  { %340 = vmatmul.msk.f32.gmra.mxu0 %vm54_vm0, %v51_v8  ;;  %344 = vmatmul.msk.f32.gmra.mxu1 %vm54_vm0, %v47_v9  ;;  %v171_v27 = vld [vmem:[%s543_s5] sm:$0xff]  ;;  %v170_v45 = vld [vmem:[%s542_s4 + $0x8] sm:$0xff]  ;;  %v43_v58 = vld [vmem:[%s538_s0 + $0x10] sm:$0xff] }
   0xe   :  { %180 = vperm.xlu2 %357, %v172_v22   ;;  %v169_v44 = vld [vmem:[%s542_s4] sm:$0xff] }
   0xf   :  { %143 = vperm.xlu1 %356, %v137_v10   ;;  %153 = vperm.xlu0 %355, %v139_v11   ;;  %v215_v54 = vld [vmem:[%s544_s6] sm:$0xff] }
  0x10   :  { %v41_v57 = vld [vmem:[%s538_s0] sm:$0xff]  ;;  %s389_s0 = smov [#allocation3]  }
  0x11   :  { %v248_v61 = vld [vmem:[%s547_s9] sm:$0x1]  ;;  %v45_v62 = vmul.f32 %v43_v58, %v41_v57 }
  0x12   :  { %v247_v63 = vld [vmem:[%s546_s8] sm:$0x1]  ;;  %s328_s8 = sshll.u32 %s389_s0, 4  ;;  %s329_s8 = int_to_ptr.vmem [resolvable:$true] %s328_s8 }
  0x15   :  { %341 = vmatmul.msk.f32.gmra.mxu0 %vm54_vm0, %v52_v12  ;;  %345 = vmatmul.msk.f32.gmra.mxu1 %vm54_vm0, %v48_v13 }
  0x16   :  { %175 = vperm.xlu2 %357, %v171_v27  }
  0x17   :  { %219 = vperm.xlu0 %355, %v216_v14   ;;  %298 = vperm.xlu1 %356, %v249_v15  }
  0x1d   :  { %342 = vmatmul.msk.f32.gmra.mxu0 %vm54_vm0, %v53_v16  ;;  %346 = vmatmul.msk.f32.gmra.mxu1 %vm54_vm0, %v49_v17 }
  0x68   :  { %v181_v46 = vpop.permute.xlu2 %180 }
  0x70   :  { %v176_v48 = vpop.permute.xlu2 %175 }
  0x79   :  { %v159_v23 = vpop.permute.xlu0 %158  ;;  %v149_v26 = vpop.permute.xlu1 %148 }
  0x81   :  { %v154_v33 = vpop.permute.xlu0 %153  ;;  %v144_v37 = vpop.permute.xlu1 %143 }
  0x82   :  { %v84_v18 = vpop.f32.mrf.mxu0  ;;  %v125_v19 = vpop.f32.mrf.mxu1 }
  0x83   :  { %v126_v34 = vadd.f32 %v125_v19, %v84_v18 }
  0x85   :  { %v161_v40 = vadd.f32 %v144_v37, %v126_v34 }
  0x87   :  { %v165_v43 = vmax.f32 %v161_v40, 0.0 }
  0x89   :  { %v220_v55 = vpop.permute.xlu0 %219  ;;  %v299_v1 = vpop.permute.xlu1 %298 }
  0x8a   :  { %v87_v20 = vpop.f32.mrf.mxu0  ;;  %v128_v21 = vpop.f32.mrf.mxu1  ;;  %v301_v3 = vperm.slane %v299_v1, 0 }
  0x8b   :  { %v129_v31 = vadd.f32 %v128_v21, %v87_v20 }
  0x8d   :  { %v162_v39 = vadd.f32 %v149_v26, %v129_v31 }
  0x8f   :  { %v166_v42 = vmax.f32 %v162_v39, 0.0 }
  0x92   :  { %v90_v24 = vpop.f32.mrf.mxu0  ;;  %v131_v25 = vpop.f32.mrf.mxu1 }
  0x93   :  { %v132_v28 = vadd.f32 %v131_v25, %v90_v24 }
  0x95   :  { %v163_v36 = vadd.f32 %v154_v33, %v132_v28 }
  0x97   :  { %v167_v41 = vmax.f32 %v163_v36, 0.0 }
  0x9a   :  { %v93_v29 = vpop.f32.mrf.mxu0  ;;  %v134_v30 = vpop.f32.mrf.mxu1 }
  0x9b   :  { %v135_v32 = vadd.f32 %v134_v30, %v93_v29 }
  0x9d   :  { %v164_v35 = vadd.f32 %v159_v23, %v135_v32 }
  0x9f   :  { %v168_v38 = vmax.f32 %v164_v35, 0.0 }
  0xa1   :  { %202 = vmatpush.msra.mxu2 %v168_v38 }
  0xa3   :  { %203 = vmatpush.msra.mxu2 %v167_v41 }
  0xa5   :  { %204 = vmatpush.msra.mxu2 %v166_v42 }
  0xa7   :  { %205 = vmatpush.msra.mxu2 %v165_v43 }
  0xa8   :  { %347 = vmatmul.msk.f32.vlgmr.msra.gmra.mxu2 %vm183_vm1, %v169_v44 }
  0xb0   :  { %348 = vmatmul.msk.f32.gmra.mxu2 %vm183_vm1, %v170_v45 }
 0x12b   :  { %v207_v47 = vpop.f32.mrf.mxu2 }
 0x12c   :  { %v208_v50 = vadd.f32 %v207_v47, %v176_v48 }
 0x12e   :  { %v213_v53 = vmax.f32 %v208_v50, 0.0 }
 0x133   :  { %v210_v49 = vpop.f32.mrf.mxu2 }
 0x134   :  { %v211_v51 = vadd.f32 %v210_v49, %v181_v46 }
 0x136   :  { %v214_v52 = vmax.f32 %v211_v51, 0.0 }
 0x138   :  { %240 = vmatpush.msra.mxu3 %v214_v52 }
 0x13a   :  { %241 = vmatpush.msra.mxu3 %v213_v53 }
 0x13b   :  { %349 = vmatmul.msk.f32.vlgmr.msra.gmra.mxu3 %vm222_vm2, %v215_v54 }
 0x1be   :  { %v243_v56 = vpop.f32.mrf.mxu3 }
 0x1bf   :  { %v244_v59 = vadd.f32 %v243_v56, %v220_v55 }
 0x1c1   :  { %v246_v60 = vmax.f32 %v244_v59, 0.0 }
 0x1c3   :  { %268 = vmatpush.msrb.mxu3 %v246_v60 }
 0x1c4   :  { %350 = vmatmul.msk.f32.vlgmr.msrb.gmra.mxu3 %vm54_vm0, %v248_v61 }
 0x1c5   :  { %291 = vmatpush.msra.mxu3 %v45_v62 }
 0x1cc   :  { %351 = vmatmul.msk.f32.vlgmr.msra.gmra.mxu3 %vm54_vm0, %v247_v63 }
 0x247   :  { %v270_v0 = vpop.f32.mrf.mxu3 }
 0x24f   :  { %v293_v2 = vpop.f32.mrf.mxu3 }
 0x250   :  { %v294_v4 = vadd.f32 %v293_v2, %v270_v0 }
 0x252   :  { %v302_v5 = vadd.f32 %v301_v3, %v294_v4 }
 0x254   :  { %v352_v6 = vmul.f32 -1.442695, %v302_v5 }
 0x256   :  { %358 = vpow2.f32 %v352_v6 }
 0x25c   :  { %v359_v7 = vpop.eup %358 }
 0x25d   :  { %v306_v8 = vadd.f32 1.0, %v359_v7 }
 0x25f   :  { %360 = vrcp.f32 %v306_v8  ;;  %v318_v12 = vand.u32 2147483648, %v306_v8  ;;  %v316_v14 = vand.u32 2147483647, %v306_v8  ;;  %vm312_vm4 = vweird.f32 %v306_v8 }
 0x261   :  { %v319_v16 = vor.u32 1.1754944e-38, %v318_v12  ;;  %vm317_vm6 = vcmp.eq.f32.partialorder %v316_v14, 8.507059e+37 }
 0x265   :  { %v361_v9 = vpop.eup %360 }
 0x266   :  { %v308_v10 = vmul.f32 %v361_v9, %v306_v8  ;;  %vm313_vm3 = vweird.f32 %v361_v9 }
 0x267   :  { %vm314_vm5 = vmor %vm312_vm4, %vm313_vm3 }
 0x268   :  { %v309_v11 = vsub.f32 1.0, %v308_v10 }
 0x26a   :  { %v310_v13 = vmul.f32 %v361_v9, %v309_v11 }
 0x26c   :  { %v311_v15 = vadd.f32 %v361_v9, %v310_v13 }
 0x26e   :  { %v315_v17 = vsel %vm314_vm5, %v361_v9, %v311_v15 }
 0x26f   :  { %v320_v18 = vsel %vm317_vm6, %v319_v16, %v315_v17 }
 0x270   :  { %322 = vst [vmem:[#allocation3] sm:$0x1] %v320_v18 }
 0x271   :  { %333 = dma.vmem_to_hbm [thread:$0]  %s329_s8, 16, %s331_s21, [#allocation4]  }
 0x272   :  { %386 = dma.done.wait [#allocation4], 16  }
 0x273   :  { %387 = vsyncadd [#allocation4], 4294967280 }
 0x274   :  { %338 = vsyncpa [#allocation4], 1 }

</bundles_post_ra>
